<compile_context>
chip_gen: v5e
topology: v5e:2x2
jax: 0.10.0
libtpu: 0.0.40
codegen_flags: <defaults>
</compile_context>

<pallas_src>
import functools

import jax
import jax.numpy as jnp
from jax import lax
from jax.experimental import pallas as pl
from jax.experimental.pallas import tpu as pltpu


def adapter_kernel(x_ref, w1_ref, b1_ref, w2_ref, b2_ref, t_ref, out_ref):
    # Two-layer MLP head: two MXU matmuls with f32 accumulation (biases in f32).
    h = jnp.dot(x_ref[...], w1_ref[...], preferred_element_type=jnp.float32)
    h = jnp.maximum(h + b1_ref[...], 0.0)
    img = jnp.dot(h.astype(w2_ref.dtype), w2_ref[...],
                  preferred_element_type=jnp.float32) + b2_ref[...]

    # Row-wise L2 normalization in f32. Padded feature columns are exactly zero
    # (zero weight columns + zero bias padding), so they do not perturb the norm.
    # rsqrt is a single EUP op; the eps avoids 0/0 for all-zero (padding) rows.
    inv_norm = lax.rsqrt(jnp.sum(img * img, axis=1, keepdims=True) + 1e-24)
    img = img * inv_norm

    # t_ref is pre-normalized, pre-scaled by exp(logit_scale) and pre-transposed
    # to (out_dim, C): a single MXU matmul, no in-kernel transpose or scaling.
    out_ref[...] = jnp.dot(img.astype(t_ref.dtype), t_ref[...],
                           preferred_element_type=jnp.float32)


def _round_up(n, m):
    return ((n + m - 1) // m) * m


def _pad2(a, rows, cols):
    return jnp.pad(a, ((0, rows - a.shape[0]), (0, cols - a.shape[1])))


@functools.partial(jax.jit, static_argnames=("compute_dtype", "block_b"))
def single_adapter_forward(x, w1, b1, w2, b2, text_embeddings, logit_scale,
                           *, compute_dtype=jnp.float32, block_b=None):
    B, in_dim = x.shape
    out_dim = w1.shape[1]
    C = text_embeddings.shape[0]

    # 128-aligned lane dims, 8-aligned batch tile.
    in_p = _round_up(in_dim, 128)
    out_p = _round_up(out_dim, 128)
    c_p = _round_up(C, 128)
    if block_b is None:
        block_b = min(_round_up(B, 8), 256)
    b_p = _round_up(B, block_b)

    f32 = jnp.float32

    # Hoisted text-side work: L2-normalize rows, fold in exp(logit_scale), transpose.
    t = jnp.asarray(text_embeddings, f32)
    t = t * lax.rsqrt(jnp.sum(t * t, axis=1, keepdims=True) + 1e-24)
    t = (t * jnp.exp(jnp.asarray(logit_scale, f32))).T          # (out_dim, C)

    x_p = _pad2(jnp.asarray(x, f32), b_p, in_p).astype(compute_dtype)
    w1_p = _pad2(jnp.asarray(w1, f32), in_p, out_p).astype(compute_dtype)
    w2_p = _pad2(jnp.asarray(w2, f32), out_p, out_p).astype(compute_dtype)
    t_p = _pad2(t, out_p, c_p).astype(compute_dtype)
    b1_p = jnp.pad(jnp.asarray(b1, f32), (0, out_p - out_dim)).reshape(1, out_p)
    b2_p = jnp.pad(jnp.asarray(b2, f32), (0, out_p - out_dim)).reshape(1, out_p)

    grid = (b_p // block_b,)
    resident = lambda i: (0, 0)   # same block every grid step -> stays in VMEM

    itemsize = jnp.dtype(compute_dtype).itemsize
    weight_bytes = (in_p * out_p + out_p * out_p + out_p * c_p) * itemsize + 2 * out_p * 4
    stream_bytes = 2 * block_b * (in_p * itemsize + c_p * 4)  # double-buffered x / out tiles
    vmem_limit = int(min(64 << 20, max(32 << 20, 2 * (weight_bytes + stream_bytes))))

    flops = 2 * b_p * (in_p * out_p + out_p * out_p + out_p * c_p)
    bytes_accessed = int(b_p * in_p * itemsize + weight_bytes + b_p * c_p * 4)

    out_padded = pl.pallas_call(
        adapter_kernel,
        out_shape=jax.ShapeDtypeStruct((b_p, c_p), jnp.float32),
        grid_spec=pltpu.PrefetchScalarGridSpec(
            num_scalar_prefetch=0,
            grid=grid,
            in_specs=[
                pl.BlockSpec((block_b, in_p), lambda i: (i, 0)),   # x tile (streamed)
                pl.BlockSpec((in_p, out_p), resident),             # W1   (resident)
                pl.BlockSpec((1, out_p), resident),                # b1   (resident)
                pl.BlockSpec((out_p, out_p), resident),            # W2   (resident)
                pl.BlockSpec((1, out_p), resident),                # b2   (resident)
                pl.BlockSpec((out_p, c_p), resident),              # text (resident)
            ],
            out_specs=pl.BlockSpec((block_b, c_p), lambda i: (i, 0)),
        ),
        compiler_params=pltpu.CompilerParams(
            dimension_semantics=("parallel",),   # batch tiles split across TCs on v7x
            vmem_limit_bytes=vmem_limit,
        ),
        cost_estimate=pl.CostEstimate(
            flops=int(flops),
            transcendentals=int(b_p),
            bytes_accessed=bytes_accessed,
        ),
    )(x_p, w1_p, b1_p, w2_p, b2_p, t_p)

    return out_padded[:B, :C]


def reference_forward(x, w1, b1, w2, b2, text_embeddings, logit_scale):
    h = jnp.maximum(x @ w1 + b1, 0.0)
    img = h @ w2 + b2
    img = img / jnp.linalg.norm(img, axis=1, keepdims=True)
    t = text_embeddings / jnp.linalg.norm(text_embeddings, axis=1, keepdims=True)
    return (img @ t.T) * jnp.exp(logit_scale)


if __name__ == "__main__":
    # Small shapes consistent with the module: batch=8 image embeddings of dim 64,
    # adapter output dim 32, 16 text classes.
    B, in_dim, out_dim, C = 8, 64, 32, 16

    key = jax.random.PRNGKey(0)
    k_x, k_w1, k_b1, k_w2, k_b2, k_t = jax.random.split(key, 6)

    x = jax.random.normal(k_x, (B, in_dim), dtype=jnp.float32)
    # PyTorch Linear stores weight as (out, in); we keep the transposed (in, out) layout.
    w1 = jax.random.normal(k_w1, (in_dim, out_dim), dtype=jnp.float32) * (1.0 / in_dim) ** 0.5
    b1 = jax.random.normal(k_b1, (out_dim,), dtype=jnp.float32) * 0.01
    w2 = jax.random.normal(k_w2, (out_dim, out_dim), dtype=jnp.float32) * (1.0 / out_dim) ** 0.5
    b2 = jax.random.normal(k_b2, (out_dim,), dtype=jnp.float32) * 0.01
    text_embeddings = jax.random.normal(k_t, (C, out_dim), dtype=jnp.float32)
    initial_logit_scale = jnp.float32(2.6592)  # log(1/0.07), CLIP-style

    ref = reference_forward(x, w1, b1, w2, b2, text_embeddings, initial_logit_scale)

    out = single_adapter_forward(x, w1, b1, w2, b2, text_embeddings, initial_logit_scale)
    out = jax.block_until_ready(out)
    assert out.shape == (B, C)
    # Tolerance accounts for TPU MXU reduced-precision f32 matmul paths.
    assert jnp.allclose(out, ref, atol=3e-2, rtol=2e-2), (
        f"max abs err {float(jnp.max(jnp.abs(out - ref)))}")

    print("KERNEL_OK")
</pallas_src>

<mosaic_0001>
module attributes {stable_mosaic.version = 11 : i64} {
  func.func @adapter_kernel(%arg0: i32, %arg1: memref<8x128xf32, #tpu.memory_space<vmem>>, %arg2: memref<128x128xf32, #tpu.memory_space<vmem>>, %arg3: memref<1x128xf32, #tpu.memory_space<vmem>>, %arg4: memref<128x128xf32, #tpu.memory_space<vmem>>, %arg5: memref<1x128xf32, #tpu.memory_space<vmem>>, %arg6: memref<128x128xf32, #tpu.memory_space<vmem>>, %arg7: memref<8x128xf32, #tpu.memory_space<vmem>>) attributes {dimension_semantics = [#tpu.dimension_semantics<parallel>], iteration_bounds = array<i64: 1>, scalar_prefetch = 0 : i64, scratch_operands = 0 : i64, tpu.core_type = #tpu.core_type<tc>, window_params = [{transform_indices = @transform_0, window_bounds = array<i64: 8, 128>}, {pipeline_mode = #tpu.pipeline_mode<synchronous>, transform_indices = @transform_1, window_bounds = array<i64: 128, 128>}, {pipeline_mode = #tpu.pipeline_mode<synchronous>, transform_indices = @transform_2, window_bounds = array<i64: 1, 128>}, {pipeline_mode = #tpu.pipeline_mode<synchronous>, transform_indices = @transform_3, window_bounds = array<i64: 128, 128>}, {pipeline_mode = #tpu.pipeline_mode<synchronous>, transform_indices = @transform_4, window_bounds = array<i64: 1, 128>}, {pipeline_mode = #tpu.pipeline_mode<synchronous>, transform_indices = @transform_5, window_bounds = array<i64: 128, 128>}, {transform_indices = @transform_6, window_bounds = array<i64: 8, 128>}]} {
    %c0 = arith.constant 0 : index
    %c0_0 = arith.constant 0 : index
    %0 = vector.load %arg1[%c0, %c0_0] : memref<8x128xf32, #tpu.memory_space<vmem>>, vector<8x128xf32>
    %c0_1 = arith.constant 0 : index
    %c0_2 = arith.constant 0 : index
    %1 = vector.load %arg2[%c0_1, %c0_2] : memref<128x128xf32, #tpu.memory_space<vmem>>, vector<128x128xf32>
    %cst = arith.constant dense<0.000000e+00> : vector<8x128xf32>
    %2 = tpu.matmul %0, %1, %cst {dimension_numbers = #tpu.dot_dimension_numbers<[1], [0], [0], [1], [0, 0, 1, 1], [], []>} : vector<8x128xf32>, vector<128x128xf32>, vector<8x128xf32> -> vector<8x128xf32>
    %c0_3 = arith.constant 0 : index
    %c0_4 = arith.constant 0 : index
    %3 = vector.load %arg3[%c0_3, %c0_4] : memref<1x128xf32, #tpu.memory_space<vmem>>, vector<1x128xf32>
    %4 = vector.broadcast %3 : vector<1x128xf32> to vector<8x128xf32>
    %5 = arith.addf %2, %4 : vector<8x128xf32>
    %cst_5 = arith.constant 0.000000e+00 : f32
    %6 = vector.broadcast %cst_5 : f32 to vector<8x128xf32>
    %7 = arith.maximumf %5, %6 : vector<8x128xf32>
    %c0_6 = arith.constant 0 : index
    %c0_7 = arith.constant 0 : index
    %8 = vector.load %arg4[%c0_6, %c0_7] : memref<128x128xf32, #tpu.memory_space<vmem>>, vector<128x128xf32>
    %cst_8 = arith.constant dense<0.000000e+00> : vector<8x128xf32>
    %9 = tpu.matmul %7, %8, %cst_8 {dimension_numbers = #tpu.dot_dimension_numbers<[1], [0], [0], [1], [0, 0, 1, 1], [], []>} : vector<8x128xf32>, vector<128x128xf32>, vector<8x128xf32> -> vector<8x128xf32>
    %c0_9 = arith.constant 0 : index
    %c0_10 = arith.constant 0 : index
    %10 = vector.load %arg5[%c0_9, %c0_10] : memref<1x128xf32, #tpu.memory_space<vmem>>, vector<1x128xf32>
    %11 = vector.broadcast %10 : vector<1x128xf32> to vector<8x128xf32>
    %12 = arith.addf %9, %11 : vector<8x128xf32>
    %13 = arith.mulf %12, %12 : vector<8x128xf32>
    %cst_11 = arith.constant dense<0.000000e+00> : vector<8xf32>
    %14 = vector.multi_reduction <add>, %13, %cst_11 [1] : vector<8x128xf32> to vector<8xf32>
    %15 = vector.shape_cast %14 : vector<8xf32> to vector<8x1xf32>
    %cst_12 = arith.constant 1.000000e-24 : f32
    %16 = vector.broadcast %cst_12 : f32 to vector<8x1xf32>
    %17 = arith.addf %15, %16 : vector<8x1xf32>
    %18 = math.rsqrt %17 : vector<8x1xf32>
    %19 = vector.broadcast %18 : vector<8x1xf32> to vector<8x128xf32>
    %20 = arith.mulf %12, %19 : vector<8x128xf32>
    %c0_13 = arith.constant 0 : index
    %c0_14 = arith.constant 0 : index
    %21 = vector.load %arg6[%c0_13, %c0_14] : memref<128x128xf32, #tpu.memory_space<vmem>>, vector<128x128xf32>
    %cst_15 = arith.constant dense<0.000000e+00> : vector<8x128xf32>
    %22 = tpu.matmul %20, %21, %cst_15 {dimension_numbers = #tpu.dot_dimension_numbers<[1], [0], [0], [1], [0, 0, 1, 1], [], []>} : vector<8x128xf32>, vector<128x128xf32>, vector<8x128xf32> -> vector<8x128xf32>
    %c0_16 = arith.constant 0 : index
    %c0_17 = arith.constant 0 : index
    %23 = vector.load %arg7[%c0_16, %c0_17] : memref<8x128xf32, #tpu.memory_space<vmem>>, vector<8x128xf32>
    tpu.vector_store %arg7[%c0_16, %c0_17], %22 {strides = array<i32>} : memref<8x128xf32, #tpu.memory_space<vmem>>, vector<8x128xf32>,
    return
  }
  func.func @transform_0(%arg0: i32) -> (i32, i32) {
    %c0_i32 = arith.constant 0 : i32
    %c0_i32_0 = arith.constant 0 : i32
    return %arg0, %c0_i32 : i32, i32
  }
  func.func @transform_1(%arg0: i32) -> (i32, i32) {
    %c0_i32 = arith.constant 0 : i32
    %c0_i32_0 = arith.constant 0 : i32
    %c0_i32_1 = arith.constant 0 : i32
    return %c0_i32, %c0_i32_0 : i32, i32
  }
  func.func @transform_2(%arg0: i32) -> (i32, i32) {
    %c0_i32 = arith.constant 0 : i32
    %c0_i32_0 = arith.constant 0 : i32
    %c0_i32_1 = arith.constant 0 : i32
    return %c0_i32, %c0_i32_0 : i32, i32
  }
  func.func @transform_3(%arg0: i32) -> (i32, i32) {
    %c0_i32 = arith.constant 0 : i32
    %c0_i32_0 = arith.constant 0 : i32
    %c0_i32_1 = arith.constant 0 : i32
    return %c0_i32, %c0_i32_0 : i32, i32
  }
  func.func @transform_4(%arg0: i32) -> (i32, i32) {
    %c0_i32 = arith.constant 0 : i32
    %c0_i32_0 = arith.constant 0 : i32
    %c0_i32_1 = arith.constant 0 : i32
    return %c0_i32, %c0_i32_0 : i32, i32
  }
  func.func @transform_5(%arg0: i32) -> (i32, i32) {
    %c0_i32 = arith.constant 0 : i32
    %c0_i32_0 = arith.constant 0 : i32
    %c0_i32_1 = arith.constant 0 : i32
    return %c0_i32, %c0_i32_0 : i32, i32
  }
  func.func @transform_6(%arg0: i32) -> (i32, i32) {
    %c0_i32 = arith.constant 0 : i32
    %c0_i32_0 = arith.constant 0 : i32
    return %arg0, %c0_i32 : i32, i32
  }
}

</mosaic_0001>

<bundles_post_ra>
// kernel: single_adapter_forward.1
= control target key start
LH: loop header
LB: loop body
LE: loop exit
PB: predicated region body
PF: predicated region fallthrough
CT: control target
= control target key end

     0   :  { %s397_s0 = inlined_call_operand.vmem [shape: f32[8,128], index: 0, kind: input, shape index: {}]   ;;  %s398_s1 = inlined_call_operand.vmem [shape: f32[128,128], index: 1, kind: input, shape index: {}]   ;;  %s399_s2 = inlined_call_operand.vmem [shape: f32[1,128], index: 2, kind: input, shape index: {}]   ;;  %s400_s3 = inlined_call_operand.vmem [shape: f32[128,128], index: 3, kind: input, shape index: {}]   ;;  %s401_s4 = inlined_call_operand.vmem [shape: f32[1,128], index: 4, kind: input, shape index: {}]   ;;  %s402_s5 = inlined_call_operand.vmem [shape: f32[128,128], index: 5, kind: input, shape index: {}]   ;;  %s403_s6 = inlined_call_operand.hbm [shape: f32[8,128], index: 6, kind: output, shape index: {}]  }
   0x1   :  { %v40_v0 = vld [vmem:[%s398_s1 + $0x78] sm:$0xff]  ;;  %v39_v1 = vld [vmem:[%s398_s1 + $0x70] sm:$0xff]  ;;  %v38_v2 = vld [vmem:[%s398_s1 + $0x68] sm:$0xff] }
   0x2   :  { %45 = vmatpush.msra.mxu0 %v40_v0  ;;  %v37_v3 = vld [vmem:[%s398_s1 + $0x60] sm:$0xff]  ;;  %v81_v4 = vld [vmem:[%s400_s3 + $0x78] sm:$0xff]  ;;  %v80_v6 = vld [vmem:[%s400_s3 + $0x70] sm:$0xff] }
   0x3   :  { %v36_v5 = vld [vmem:[%s398_s1 + $0x58] sm:$0xff]  ;;  %86 = vmatpush.msra.mxu1 %v81_v4  ;;  %v79_v7 = vld [vmem:[%s400_s3 + $0x68] sm:$0xff]  ;;  %v35_v8 = vld [vmem:[%s398_s1 + $0x50] sm:$0xff] }
   0x4   :  { %46 = vmatpush.msra.mxu0 %v39_v1  ;;  %v78_v9 = vld [vmem:[%s400_s3 + $0x60] sm:$0xff]  ;;  %v34_v10 = vld [vmem:[%s398_s1 + $0x48] sm:$0xff]  ;;  %v77_v11 = vld [vmem:[%s400_s3 + $0x58] sm:$0xff] }
   0x5   :  { %87 = vmatpush.msra.mxu1 %v80_v6 }
   0x6   :  { %47 = vmatpush.msra.mxu0 %v38_v2 }
   0x7   :  { %88 = vmatpush.msra.mxu1 %v79_v7 }
   0x8   :  { %48 = vmatpush.msra.mxu0 %v37_v3 }
   0xa   :  { %49 = vmatpush.msra.mxu0 %v36_v5 }
   0xc   :  { %50 = vmatpush.msra.mxu0 %v35_v8 }
   0xd   :  { %11 = vsyncpa [#allocation3], 0  ;;  %v33_v12 = vld [vmem:[%s398_s1 + $0x40] sm:$0xff]  ;;  %89 = vmatpush.msra.mxu1 %v78_v9  ;;  %v76_v13 = vld [vmem:[%s400_s3 + $0x50] sm:$0xff]  ;;  %s165_s21 = sshll.u32 %s403_s6, 4  ;;  %s166_s21 = int_to_ptr.hbm [resolvable:$true] %s165_s21 }
   0xe   :  { %51 = vmatpush.msra.mxu0 %v34_v10  ;;  %v32_v14 = vld [vmem:[%s398_s1 + $0x38] sm:$0xff]  ;;  %v75_v15 = vld [vmem:[%s400_s3 + $0x48] sm:$0xff]  ;;  %v31_v16 = vld [vmem:[%s398_s1 + $0x30] sm:$0xff] }
   0xf   :  { %90 = vmatpush.msra.mxu1 %v77_v11  ;;  %v74_v17 = vld [vmem:[%s400_s3 + $0x40] sm:$0xff]  ;;  %v30_v18 = vld [vmem:[%s398_s1 + $0x28] sm:$0xff]  ;;  %v73_v19 = vld [vmem:[%s400_s3 + $0x38] sm:$0xff] }
  0x10   :  { %52 = vmatpush.msra.mxu0 %v33_v12  ;;  %v29_v20 = vld [vmem:[%s398_s1 + $0x20] sm:$0xff]  ;;  %v72_v21 = vld [vmem:[%s400_s3 + $0x30] sm:$0xff]  ;;  %v28_v22 = vld [vmem:[%s398_s1 + $0x18] sm:$0xff] }
  0x11   :  { %91 = vmatpush.msra.mxu1 %v76_v13  ;;  %v71_v23 = vld [vmem:[%s400_s3 + $0x28] sm:$0xff]  ;;  %v27_v24 = vld [vmem:[%s398_s1 + $0x10] sm:$0xff]  ;;  %v70_v25 = vld [vmem:[%s400_s3 + $0x20] sm:$0xff] }
  0x12   :  { %53 = vmatpush.msra.mxu0 %v32_v14  ;;  %v26_v26 = vld [vmem:[%s398_s1 + $0x8] sm:$0xff]  ;;  %v69_v27 = vld [vmem:[%s400_s3 + $0x18] sm:$0xff]  ;;  %v25_v28 = vld [vmem:[%s398_s1] sm:$0xff] }
  0x13   :  { %92 = vmatpush.msra.mxu1 %v75_v15  ;;  %v24_v29 = vld [vmem:[%s397_s0] sm:$0xff]  ;;  %v68_v30 = vld [vmem:[%s400_s3 + $0x10] sm:$0xff]  ;;  %v67_v31 = vld [vmem:[%s400_s3 + $0x8] sm:$0xff] }
  0x14   :  { %54 = vmatpush.msra.mxu0 %v31_v16  ;;  %v66_v32 = vld [vmem:[%s400_s3] sm:$0xff]  ;;  %v136_v37 = vld [vmem:[%s402_s5 + $0x78] sm:$0xff]  ;;  %v135_v38 = vld [vmem:[%s402_s5 + $0x70] sm:$0xff]  ;;  %s205_s3 = smov [#allocation2]  }
  0x15   :  { %93 = vmatpush.msra.mxu1 %v74_v17  ;;  %v175_v33 = vld [vmem:[%s399_s2] ss:$0 sm:$0xff]  ;;  %137 = vmatpush.msra.mxu2 %v136_v37  ;;  %v134_v39 = vld [vmem:[%s402_s5 + $0x68] sm:$0xff]  ;;  %v132_v45 = vld [vmem:[%s402_s5 + $0x58] sm:$0xff]  ;;  %s163_s20 = sshll.u32 %s205_s3, 4  ;;  %s164_s20 = int_to_ptr.vmem [resolvable:$true] %s163_s20 }
  0x16   :  { %55 = vmatpush.msra.mxu0 %v30_v18  ;;  %v133_v40 = vld [vmem:[%s402_s5 + $0x60] sm:$0xff]  ;;  %v131_v46 = vld [vmem:[%s402_s5 + $0x50] sm:$0xff]  ;;  %v130_v47 = vld [vmem:[%s402_s5 + $0x48] sm:$0xff] }
  0x17   :  { %94 = vmatpush.msra.mxu1 %v73_v19  ;;  %138 = vmatpush.msra.mxu2 %v135_v38  ;;  %v176_v41 = vld [vmem:[%s401_s4] ss:$0 sm:$0xff]  ;;  %v128_v49 = vld [vmem:[%s402_s5 + $0x38] sm:$0xff]  ;;  %v127_v50 = vld [vmem:[%s402_s5 + $0x30] sm:$0xff] }
  0x18   :  { %56 = vmatpush.msra.mxu0 %v29_v20  ;;  %v129_v48 = vld [vmem:[%s402_s5 + $0x40] sm:$0xff]  ;;  %v126_v51 = vld [vmem:[%s402_s5 + $0x28] sm:$0xff]  ;;  %v124_v53 = vld [vmem:[%s402_s5 + $0x18] sm:$0xff] }
  0x19   :  { %95 = vmatpush.msra.mxu1 %v72_v21  ;;  %139 = vmatpush.msra.mxu2 %v134_v39  ;;  %v125_v52 = vld [vmem:[%s402_s5 + $0x20] sm:$0xff]  ;;  %v123_v54 = vld [vmem:[%s402_s5 + $0x10] sm:$0xff]  ;;  %v122_v55 = vld [vmem:[%s402_s5 + $0x8] sm:$0xff] }
  0x1a   :  { %57 = vmatpush.msra.mxu0 %v28_v22  ;;  %v121_v56 = vld [vmem:[%s402_s5] sm:$0xff] }
  0x1b   :  { %96 = vmatpush.msra.mxu1 %v71_v23  ;;  %140 = vmatpush.msra.mxu2 %v133_v40 }
  0x1c   :  { %58 = vmatpush.msra.mxu0 %v27_v24 }
  0x1d   :  { %97 = vmatpush.msra.mxu1 %v70_v25  ;;  %141 = vmatpush.msra.mxu2 %v132_v45 }
  0x1e   :  { %59 = vmatpush.msra.mxu0 %v26_v26 }
  0x1f   :  { %98 = vmatpush.msra.mxu1 %v69_v27  ;;  %142 = vmatpush.msra.mxu2 %v131_v46 }
  0x20   :  { %60 = vmatpush.msra.mxu0 %v25_v28 }
  0x21   :  { %61 = vmatmul.f32.vlgmr.msra.gmra.mxu0 %v24_v29  ;;  %99 = vmatpush.msra.mxu1 %v68_v30 }
  0x22   :  { %143 = vmatpush.msra.mxu2 %v130_v47 }
  0x23   :  { %100 = vmatpush.msra.mxu1 %v67_v31 }
  0x24   :  { %144 = vmatpush.msra.mxu2 %v129_v48 }
  0x25   :  { %101 = vmatpush.msra.mxu1 %v66_v32 }
  0x26   :  { %145 = vmatpush.msra.mxu2 %v128_v49 }
  0x28   :  { %146 = vmatpush.msra.mxu2 %v127_v50 }
  0x2a   :  { %147 = vmatpush.msra.mxu2 %v126_v51 }
  0x2c   :  { %148 = vmatpush.msra.mxu2 %v125_v52 }
  0x2e   :  { %149 = vmatpush.msra.mxu2 %v124_v53 }
  0x30   :  { %150 = vmatpush.msra.mxu2 %v123_v54 }
  0x32   :  { %151 = vmatpush.msra.mxu2 %v122_v55 }
  0x34   :  { %152 = vmatpush.msra.mxu2 %v121_v56 }
  0x9e   :  { %v62_v34 = vpop.f32.mrf.mxu0 }
  0x9f   :  { %v63_v35 = vadd.f32 %v175_v33, %v62_v34 }
  0xa1   :  { %v65_v36 = vmax.f32 %v63_v35, 0.0 }
  0xa3   :  { %102 = vmatmul.f32.vlgmr.msra.gmra.mxu1 %v65_v36 }
 0x120   :  { %v103_v42 = vpop.f32.mrf.mxu1 }
 0x121   :  { %v104_v43 = vadd.f32 %v176_v41, %v103_v42 }
 0x123   :  { %v106_v44 = vmul.f32 %v104_v43, %v104_v43 }
 0x125   :  { %107 = vadd.xlane.f32.xlu0 %v106_v44 }
 0x198   :  { %v108_v57 = vpop.xlane.xlu0 %107 }
 0x199   :  { %v109_v58 = vadd.f32 1e-24, %v108_v57 }
 0x19b   :  { %177 = vrsqrt.f32 %v109_v58  ;;  %vm116_vm1 = vweird.f32 %v109_v58 }
 0x1a1   :  { %v178_v59 = vpop.eup %177 }
 0x1a2   :  { %v111_v60 = vmul.f32 %v178_v59, %v109_v58  ;;  %vm117_vm0 = vweird.f32 %v178_v59 }
 0x1a3   :  { %vm118_vm2 = vmor %vm116_vm1, %vm117_vm0 }
 0x1a4   :  { %v112_v61 = vmul.f32 %v178_v59, %v111_v60 }
 0x1a6   :  { %v113_v62 = vmul.f32 0.5, %v112_v61 }
 0x1a8   :  { %v114_v63 = vsub.f32 1.5, %v113_v62 }
 0x1aa   :  { %v115_v0 = vmul.f32 %v178_v59, %v114_v63 }
 0x1ac   :  { %v119_v1 = vsel %vm118_vm2, %v178_v59, %v115_v0 }
 0x1ad   :  { %v120_v2 = vmul.f32 %v119_v1, %v104_v43 }
 0x1af   :  { %153 = vmatmul.f32.vlgmr.msra.gmra.mxu2 %v120_v2 }
 0x232   :  { %v154_v3 = vpop.f32.mrf.mxu2 }
 0x233   :  { %157 = vst [vmem:[#allocation2] sm:$0xff] %v154_v3 }
 0x234   :  { %168 = dma.vmem_to_hbm [thread:$0]  %s164_s20, 128, %s166_s21, [#allocation3]  }
 0x235   :  { %203 = dma.done.wait [#allocation3], 128  }
 0x236   :  { %204 = vsyncadd [#allocation3], 4294967168 }
 0x237   :  { %173 = vsyncpa [#allocation3], 1 }

</bundles_post_ra>
